<compile_context>
chip_gen: v7x
topology: tpu7x:2x2x1
jax: 0.10.0
libtpu: 0.0.40
codegen_flags: <defaults>
</compile_context>

<pallas_src>
import functools

import jax
import jax.numpy as jnp
from jax.experimental import pallas as pl
from jax.experimental.pallas import tpu as pltpu

LRELU_SLOPE = 0.1
BN_EPS = 1e-5

# ---- packed parameter-slab layout (static row offsets, lane 0-based) --------
# Matmul weights start on 8-row boundaries so their slices map cleanly to vregs.
R_W1, R_B1, R_G1, R_BE1 = 0, 2, 3, 4          # fc1 W^T [2,8], bias/gamma/beta [1,8]
R_W2 = 8                                      # fc2 W^T [8,16]
R_B2, R_G2, R_BE2 = 16, 17, 18                # fc2 bias / bn2 gamma / bn2 beta [1,16]
R_W3 = 24                                     # fc3 W^T [16,32]
R_B3, R_G3, R_BE3 = 40, 41, 42                # fc3 bias / bn3 gamma / bn3 beta [1,32]
R_CW1 = 48                                    # conv1 W^T [32,hidden]
R_CB1, R_CW2, R_CB2 = 80, 81, 82              # conv1 bias [1,h], conv2 W row [1,h], conv2 bias [1,1]
SLAB_ROWS = 88                                # padded to a multiple of 8
SLAB_LANES = 128


def _bn_lrelu(h, gamma, beta):
    # BatchNorm1d (training-mode batch stats, biased variance) + LeakyReLU(0.1)
    mean = jnp.mean(h, axis=0, keepdims=True)
    var = jnp.mean((h - mean) ** 2, axis=0, keepdims=True)
    hn = (h - mean) * jax.lax.rsqrt(var + BN_EPS)
    hn = hn * gamma + beta
    return jnp.where(hn >= 0, hn, LRELU_SLOPE * hn)


def ngcn_kernel(x_ref, a_hat_ref, p_ref, out_ref, *, hidden, adj_bf16):
    x = x_ref[...]          # [N, 2]
    a_hat = a_hat_ref[...]  # [N, N] f32
    P = p_ref[...]          # [SLAB_ROWS, 128] packed parameters

    # ---- unpack parameter slab (all offsets static) ----
    w1 = P[R_W1:R_W1 + 2, 0:8]          # fc1 W^T  [2, 8]
    b1 = P[R_B1:R_B1 + 1, 0:8]
    g1 = P[R_G1:R_G1 + 1, 0:8]
    be1 = P[R_BE1:R_BE1 + 1, 0:8]
    w2 = P[R_W2:R_W2 + 8, 0:16]         # fc2 W^T  [8, 16]
    b2 = P[R_B2:R_B2 + 1, 0:16]
    g2 = P[R_G2:R_G2 + 1, 0:16]
    be2 = P[R_BE2:R_BE2 + 1, 0:16]
    w3 = P[R_W3:R_W3 + 16, 0:32]        # fc3 W^T  [16, 32]
    b3 = P[R_B3:R_B3 + 1, 0:32]
    g3 = P[R_G3:R_G3 + 1, 0:32]
    be3 = P[R_BE3:R_BE3 + 1, 0:32]
    cw1 = P[R_CW1:R_CW1 + 32, 0:hidden]         # conv1 W^T [32, hidden]
    cb1 = P[R_CB1:R_CB1 + 1, 0:hidden]          # [1, hidden]
    cw2_row = P[R_CW2:R_CW2 + 1, 0:hidden]      # conv2 weight as a row [1, hidden]
    cb2 = P[R_CB2:R_CB2 + 1, 0:1]               # [1, 1]

    # ---- fc1 (K=2) on the VPU: two broadcast multiply-adds, no MXU round trip
    h = x[:, 0:1] * w1[0:1, :] + x[:, 1:2] * w1[1:2, :] + b1
    h = _bn_lrelu(h, g1, be1)

    # ---- fc2 / fc3 on the MXU
    h = jnp.dot(h, w2, preferred_element_type=jnp.float32) + b2
    h = _bn_lrelu(h, g2, be2)
    h = jnp.dot(h, w3, preferred_element_type=jnp.float32) + b3
    h = _bn_lrelu(h, g3, be3)

    # ---- GCNConv1: A_hat @ (H W1^T) + b1, then leaky_relu
    h = jnp.dot(h, cw1, preferred_element_type=jnp.float32)          # [N, hidden]
    if adj_bf16:
        a_mm = a_hat.astype(jnp.bfloat16)
        h = jnp.dot(a_mm, h.astype(jnp.bfloat16),
                    preferred_element_type=jnp.float32) + cb1
    else:
        a_mm = a_hat
        h = jnp.dot(a_mm, h, preferred_element_type=jnp.float32) + cb1
    h = jnp.where(h >= 0, h, LRELU_SLOPE * h)

    # ---- GCNConv2, reordered: A_hat @ (H W2^T) == (A_hat @ H) @ W2^T.
    # Do the lane-wide aggregation on the MXU, then the [hidden]->1 projection
    # as a VPU multiply + lane reduction (avoids two 1-lane-wide MXU matmuls).
    if adj_bf16:
        t = jnp.dot(a_mm, h.astype(jnp.bfloat16),
                    preferred_element_type=jnp.float32)               # [N, hidden]
    else:
        t = jnp.dot(a_mm, h, preferred_element_type=jnp.float32)      # [N, hidden]
    y = jnp.sum(t * cw2_row, axis=-1, keepdims=True) + cb2            # [N, 1]

    # Lane-dense store: broadcast the column across 128 lanes (full unmasked vst);
    # wrapper slices column 0.
    out_ref[...] = jnp.broadcast_to(y, out_ref.shape)


def build_a_hat(edge_index, num_nodes):
    """Replicates the PyTorch edge symmetrization + PyG gcn_norm as a dense matrix."""
    e0, e1 = edge_index[0], edge_index[1]
    src = jnp.concatenate([e0, e1])
    dst = jnp.concatenate([e1, e0])
    # adjacency with message direction src -> dst; duplicates accumulate (as in PyG scatter_add)
    adj = jnp.zeros((num_nodes, num_nodes), jnp.float32).at[dst, src].add(1.0)
    adj = adj + jnp.eye(num_nodes, dtype=jnp.float32)  # self loops (fill_value=1)
    deg = jnp.sum(adj, axis=1)                         # in-degree incl. self loop
    dinv = jnp.where(deg > 0, jax.lax.rsqrt(deg), 0.0)
    return adj * dinv[:, None] * dinv[None, :]


def pack_params(params, hidden):
    """Pack all small parameters into one (SLAB_ROWS, 128) f32 slab (single DMA)."""
    assert hidden <= SLAB_LANES, "hidden_channels must fit in one 128-lane row"
    slab = jnp.zeros((SLAB_ROWS, SLAB_LANES), jnp.float32)

    def put(s, row, arr):
        arr = jnp.asarray(arr, jnp.float32)
        if arr.ndim == 1:
            arr = arr[None, :]
        r, c = arr.shape
        return s.at[row:row + r, 0:c].set(arr)

    # Linear / GCN weights are PyTorch [out, in]; store transposed [in, out].
    slab = put(slab, R_W1, params["fc1_w"].T)
    slab = put(slab, R_B1, params["fc1_b"])
    slab = put(slab, R_G1, params["bn1_g"])
    slab = put(slab, R_BE1, params["bn1_b"])
    slab = put(slab, R_W2, params["fc2_w"].T)
    slab = put(slab, R_B2, params["fc2_b"])
    slab = put(slab, R_G2, params["bn2_g"])
    slab = put(slab, R_BE2, params["bn2_b"])
    slab = put(slab, R_W3, params["fc3_w"].T)
    slab = put(slab, R_B3, params["fc3_b"])
    slab = put(slab, R_G3, params["bn3_g"])
    slab = put(slab, R_BE3, params["bn3_b"])
    slab = put(slab, R_CW1, params["conv1_w"].T)
    slab = put(slab, R_CB1, params["conv1_b"])
    slab = put(slab, R_CW2, params["conv2_w"])   # [1, hidden] row (out=1)
    slab = put(slab, R_CB2, params["conv2_b"])   # [1, 1]
    return slab


def ngcn_forward(x, edge_index, params, *, adj_bf16=False):
    n = x.shape[0]
    hidden = params["conv1_w"].shape[0]
    a_hat = build_a_hat(edge_index, n)
    slab = pack_params(params, hidden)

    kernel = functools.partial(ngcn_kernel, hidden=int(hidden), adj_bf16=adj_bf16)
    vmem = pl.BlockSpec(memory_space=pltpu.MemorySpace.VMEM)

    out_padded = pl.pallas_call(
        kernel,
        out_shape=jax.ShapeDtypeStruct((n, 128), jnp.float32),  # lane-dense output
        in_specs=[vmem, vmem, vmem],
        out_specs=vmem,
    )(x.astype(jnp.float32), a_hat, slab)

    # All 128 lanes hold the same value; column 0 is the (N, 1) result.
    return out_padded[:, :1]


def init_params(hidden_channels, key):
    """Deterministic synthetic parameters matching nGCN.__init__ shapes."""
    ks = jax.random.split(key, 10)

    def lin(k, out_f, in_f):
        bound = 1.0 / jnp.sqrt(in_f)
        kw, kb = jax.random.split(k)
        w = jax.random.uniform(kw, (out_f, in_f), jnp.float32, -bound, bound)
        b = jax.random.uniform(kb, (1, out_f), jnp.float32, -bound, bound)
        return w, b

    p = {}
    p["fc1_w"], p["fc1_b"] = lin(ks[0], 8, 2)
    p["fc2_w"], p["fc2_b"] = lin(ks[1], 16, 8)
    p["fc3_w"], p["fc3_b"] = lin(ks[2], 32, 16)
    # BatchNorm1d default init: weight=1, bias=0
    p["bn1_g"], p["bn1_b"] = jnp.ones((1, 8), jnp.float32), jnp.zeros((1, 8), jnp.float32)
    p["bn2_g"], p["bn2_b"] = jnp.ones((1, 16), jnp.float32), jnp.zeros((1, 16), jnp.float32)
    p["bn3_g"], p["bn3_b"] = jnp.ones((1, 32), jnp.float32), jnp.zeros((1, 32), jnp.float32)
    # GCNConv: Linear(in, out, bias=False) weight [out, in] + separate bias [out]
    p["conv1_w"], _ = lin(ks[3], hidden_channels, 32)
    p["conv1_b"] = jnp.zeros((1, hidden_channels), jnp.float32)
    p["conv2_w"], _ = lin(ks[4], 1, hidden_channels)
    p["conv2_b"] = jnp.zeros((1, 1), jnp.float32)
    return p


if __name__ == "__main__":
    key = jax.random.PRNGKey(0)
    k_x, k_e, k_p = jax.random.split(key, 3)

    num_nodes = 64
    num_edges = 96
    hidden_channels = 32

    # node features: [N, 2] (fc1 expects in_features=2)
    x = jax.random.normal(k_x, (num_nodes, 2), jnp.float32)
    # edge_index: [2, E] int32 node indices
    edge_index = jax.random.randint(k_e, (2, num_edges), 0, num_nodes, jnp.int32)

    params = init_params(hidden_channels, k_p)

    out = ngcn_forward(x, edge_index, params)
    out = jax.block_until_ready(out)

    assert out.shape == (num_nodes, 1)
    assert jnp.all(jnp.isfinite(out))
    print("KERNEL_OK")
</pallas_src>

<mosaic_0001>
module attributes {stable_mosaic.version = 11 : i64} {
  func.func @ngcn_kernel(%arg0: memref<64x2xf32, #tpu.memory_space<vmem>>, %arg1: memref<64x64xf32, #tpu.memory_space<vmem>>, %arg2: memref<88x128xf32, #tpu.memory_space<vmem>>, %arg3: memref<64x128xf32, #tpu.memory_space<vmem>>) attributes {dimension_semantics = [], scalar_prefetch = 0 : i64, scratch_operands = 0 : i64, tpu.core_type = #tpu.core_type<tc>} {
    %c0 = arith.constant 0 : index
    %c0_0 = arith.constant 0 : index
    %0 = vector.load %arg0[%c0, %c0_0] : memref<64x2xf32, #tpu.memory_space<vmem>>, vector<64x2xf32>
    %c0_1 = arith.constant 0 : index
    %c0_2 = arith.constant 0 : index
    %1 = vector.load %arg1[%c0_1, %c0_2] : memref<64x64xf32, #tpu.memory_space<vmem>>, vector<64x64xf32>
    %c0_3 = arith.constant 0 : index
    %c0_4 = arith.constant 0 : index
    %2 = vector.load %arg2[%c0_3, %c0_4] : memref<88x128xf32, #tpu.memory_space<vmem>>, vector<88x128xf32>
    %3 = vector.extract_strided_slice %2 {offsets = [0, 0], sizes = [2, 8], strides = [1, 1]} : vector<88x128xf32> to vector<2x8xf32>
    %4 = vector.extract_strided_slice %2 {offsets = [2, 0], sizes = [1, 8], strides = [1, 1]} : vector<88x128xf32> to vector<1x8xf32>
    %5 = vector.extract_strided_slice %2 {offsets = [3, 0], sizes = [1, 8], strides = [1, 1]} : vector<88x128xf32> to vector<1x8xf32>
    %6 = vector.extract_strided_slice %2 {offsets = [4, 0], sizes = [1, 8], strides = [1, 1]} : vector<88x128xf32> to vector<1x8xf32>
    %7 = vector.extract_strided_slice %2 {offsets = [8, 0], sizes = [8, 16], strides = [1, 1]} : vector<88x128xf32> to vector<8x16xf32>
    %8 = vector.extract_strided_slice %2 {offsets = [16, 0], sizes = [1, 16], strides = [1, 1]} : vector<88x128xf32> to vector<1x16xf32>
    %9 = vector.extract_strided_slice %2 {offsets = [17, 0], sizes = [1, 16], strides = [1, 1]} : vector<88x128xf32> to vector<1x16xf32>
    %10 = vector.extract_strided_slice %2 {offsets = [18, 0], sizes = [1, 16], strides = [1, 1]} : vector<88x128xf32> to vector<1x16xf32>
    %11 = vector.extract_strided_slice %2 {offsets = [24, 0], sizes = [16, 32], strides = [1, 1]} : vector<88x128xf32> to vector<16x32xf32>
    %12 = vector.extract_strided_slice %2 {offsets = [40, 0], sizes = [1, 32], strides = [1, 1]} : vector<88x128xf32> to vector<1x32xf32>
    %13 = vector.extract_strided_slice %2 {offsets = [41, 0], sizes = [1, 32], strides = [1, 1]} : vector<88x128xf32> to vector<1x32xf32>
    %14 = vector.extract_strided_slice %2 {offsets = [42, 0], sizes = [1, 32], strides = [1, 1]} : vector<88x128xf32> to vector<1x32xf32>
    %15 = vector.extract_strided_slice %2 {offsets = [48, 0], sizes = [32, 32], strides = [1, 1]} : vector<88x128xf32> to vector<32x32xf32>
    %16 = vector.extract_strided_slice %2 {offsets = [80, 0], sizes = [1, 32], strides = [1, 1]} : vector<88x128xf32> to vector<1x32xf32>
    %17 = vector.extract_strided_slice %2 {offsets = [81, 0], sizes = [1, 32], strides = [1, 1]} : vector<88x128xf32> to vector<1x32xf32>
    %18 = vector.extract_strided_slice %2 {offsets = [82, 0], sizes = [1, 1], strides = [1, 1]} : vector<88x128xf32> to vector<1x1xf32>
    %19 = vector.extract_strided_slice %0 {offsets = [0, 0], sizes = [64, 1], strides = [1, 1]} : vector<64x2xf32> to vector<64x1xf32>
    %20 = vector.extract_strided_slice %3 {offsets = [0, 0], sizes = [1, 8], strides = [1, 1]} : vector<2x8xf32> to vector<1x8xf32>
    %21 = vector.broadcast %19 : vector<64x1xf32> to vector<64x8xf32>
    %22 = vector.broadcast %20 : vector<1x8xf32> to vector<64x8xf32>
    %23 = arith.mulf %21, %22 : vector<64x8xf32>
    %24 = vector.extract_strided_slice %0 {offsets = [0, 1], sizes = [64, 1], strides = [1, 1]} : vector<64x2xf32> to vector<64x1xf32>
    %25 = vector.extract_strided_slice %3 {offsets = [1, 0], sizes = [1, 8], strides = [1, 1]} : vector<2x8xf32> to vector<1x8xf32>
    %26 = vector.broadcast %24 : vector<64x1xf32> to vector<64x8xf32>
    %27 = vector.broadcast %25 : vector<1x8xf32> to vector<64x8xf32>
    %28 = arith.mulf %26, %27 : vector<64x8xf32>
    %29 = arith.addf %23, %28 : vector<64x8xf32>
    %30 = vector.broadcast %4 : vector<1x8xf32> to vector<64x8xf32>
    %31 = arith.addf %29, %30 : vector<64x8xf32>
    %cst = arith.constant dense<0.000000e+00> : vector<8xf32>
    %32 = vector.multi_reduction <add>, %31, %cst [0] : vector<64x8xf32> to vector<8xf32>
    %33 = vector.shape_cast %32 : vector<8xf32> to vector<1x8xf32>
    %cst_5 = arith.constant 6.400000e+01 : f32
    %34 = vector.broadcast %cst_5 : f32 to vector<1x8xf32>
    %35 = arith.divf %33, %34 : vector<1x8xf32>
    %36 = vector.broadcast %35 : vector<1x8xf32> to vector<64x8xf32>
    %37 = arith.subf %31, %36 : vector<64x8xf32>
    %38 = arith.mulf %37, %37 : vector<64x8xf32>
    %cst_6 = arith.constant dense<0.000000e+00> : vector<8xf32>
    %39 = vector.multi_reduction <add>, %38, %cst_6 [0] : vector<64x8xf32> to vector<8xf32>
    %40 = vector.shape_cast %39 : vector<8xf32> to vector<1x8xf32>
    %cst_7 = arith.constant 6.400000e+01 : f32
    %41 = vector.broadcast %cst_7 : f32 to vector<1x8xf32>
    %42 = arith.divf %40, %41 : vector<1x8xf32>
    %43 = vector.broadcast %35 : vector<1x8xf32> to vector<64x8xf32>
    %44 = arith.subf %31, %43 : vector<64x8xf32>
    %cst_8 = arith.constant 9.99999974E-6 : f32
    %45 = vector.broadcast %cst_8 : f32 to vector<1x8xf32>
    %46 = arith.addf %42, %45 : vector<1x8xf32>
    %47 = math.rsqrt %46 : vector<1x8xf32>
    %48 = vector.broadcast %47 : vector<1x8xf32> to vector<64x8xf32>
    %49 = arith.mulf %44, %48 : vector<64x8xf32>
    %50 = vector.broadcast %5 : vector<1x8xf32> to vector<64x8xf32>
    %51 = arith.mulf %49, %50 : vector<64x8xf32>
    %52 = vector.broadcast %6 : vector<1x8xf32> to vector<64x8xf32>
    %53 = arith.addf %51, %52 : vector<64x8xf32>
    %cst_9 = arith.constant 0.000000e+00 : f32
    %54 = vector.broadcast %cst_9 : f32 to vector<64x8xf32>
    %55 = arith.cmpf oge, %53, %54 : vector<64x8xf32>
    %cst_10 = arith.constant 1.000000e-01 : f32
    %56 = vector.broadcast %cst_10 : f32 to vector<64x8xf32>
    %57 = arith.mulf %56, %53 : vector<64x8xf32>
    %58 = arith.select %55, %53, %57 : vector<64x8xi1>, vector<64x8xf32>
    %cst_11 = arith.constant dense<0.000000e+00> : vector<64x16xf32>
    %59 = tpu.matmul %58, %7, %cst_11 {dimension_numbers = #tpu.dot_dimension_numbers<[1], [0], [0], [1], [0, 0, 1, 1], [], []>} : vector<64x8xf32>, vector<8x16xf32>, vector<64x16xf32> -> vector<64x16xf32>
    %60 = vector.broadcast %8 : vector<1x16xf32> to vector<64x16xf32>
    %61 = arith.addf %59, %60 : vector<64x16xf32>
    %cst_12 = arith.constant dense<0.000000e+00> : vector<16xf32>
    %62 = vector.multi_reduction <add>, %61, %cst_12 [0] : vector<64x16xf32> to vector<16xf32>
    %63 = vector.shape_cast %62 : vector<16xf32> to vector<1x16xf32>
    %cst_13 = arith.constant 6.400000e+01 : f32
    %64 = vector.broadcast %cst_13 : f32 to vector<1x16xf32>
    %65 = arith.divf %63, %64 : vector<1x16xf32>
    %66 = vector.broadcast %65 : vector<1x16xf32> to vector<64x16xf32>
    %67 = arith.subf %61, %66 : vector<64x16xf32>
    %68 = arith.mulf %67, %67 : vector<64x16xf32>
    %cst_14 = arith.constant dense<0.000000e+00> : vector<16xf32>
    %69 = vector.multi_reduction <add>, %68, %cst_14 [0] : vector<64x16xf32> to vector<16xf32>
    %70 = vector.shape_cast %69 : vector<16xf32> to vector<1x16xf32>
    %cst_15 = arith.constant 6.400000e+01 : f32
    %71 = vector.broadcast %cst_15 : f32 to vector<1x16xf32>
    %72 = arith.divf %70, %71 : vector<1x16xf32>
    %73 = vector.broadcast %65 : vector<1x16xf32> to vector<64x16xf32>
    %74 = arith.subf %61, %73 : vector<64x16xf32>
    %cst_16 = arith.constant 9.99999974E-6 : f32
    %75 = vector.broadcast %cst_16 : f32 to vector<1x16xf32>
    %76 = arith.addf %72, %75 : vector<1x16xf32>
    %77 = math.rsqrt %76 : vector<1x16xf32>
    %78 = vector.broadcast %77 : vector<1x16xf32> to vector<64x16xf32>
    %79 = arith.mulf %74, %78 : vector<64x16xf32>
    %80 = vector.broadcast %9 : vector<1x16xf32> to vector<64x16xf32>
    %81 = arith.mulf %79, %80 : vector<64x16xf32>
    %82 = vector.broadcast %10 : vector<1x16xf32> to vector<64x16xf32>
    %83 = arith.addf %81, %82 : vector<64x16xf32>
    %cst_17 = arith.constant 0.000000e+00 : f32
    %84 = vector.broadcast %cst_17 : f32 to vector<64x16xf32>
    %85 = arith.cmpf oge, %83, %84 : vector<64x16xf32>
    %cst_18 = arith.constant 1.000000e-01 : f32
    %86 = vector.broadcast %cst_18 : f32 to vector<64x16xf32>
    %87 = arith.mulf %86, %83 : vector<64x16xf32>
    %88 = arith.select %85, %83, %87 : vector<64x16xi1>, vector<64x16xf32>
    %cst_19 = arith.constant dense<0.000000e+00> : vector<64x32xf32>
    %89 = tpu.matmul %88, %11, %cst_19 {dimension_numbers = #tpu.dot_dimension_numbers<[1], [0], [0], [1], [0, 0, 1, 1], [], []>} : vector<64x16xf32>, vector<16x32xf32>, vector<64x32xf32> -> vector<64x32xf32>
    %90 = vector.broadcast %12 : vector<1x32xf32> to vector<64x32xf32>
    %91 = arith.addf %89, %90 : vector<64x32xf32>
    %cst_20 = arith.constant dense<0.000000e+00> : vector<32xf32>
    %92 = vector.multi_reduction <add>, %91, %cst_20 [0] : vector<64x32xf32> to vector<32xf32>
    %93 = vector.shape_cast %92 : vector<32xf32> to vector<1x32xf32>
    %cst_21 = arith.constant 6.400000e+01 : f32
    %94 = vector.broadcast %cst_21 : f32 to vector<1x32xf32>
    %95 = arith.divf %93, %94 : vector<1x32xf32>
    %96 = vector.broadcast %95 : vector<1x32xf32> to vector<64x32xf32>
    %97 = arith.subf %91, %96 : vector<64x32xf32>
    %98 = arith.mulf %97, %97 : vector<64x32xf32>
    %cst_22 = arith.constant dense<0.000000e+00> : vector<32xf32>
    %99 = vector.multi_reduction <add>, %98, %cst_22 [0] : vector<64x32xf32> to vector<32xf32>
    %100 = vector.shape_cast %99 : vector<32xf32> to vector<1x32xf32>
    %cst_23 = arith.constant 6.400000e+01 : f32
    %101 = vector.broadcast %cst_23 : f32 to vector<1x32xf32>
    %102 = arith.divf %100, %101 : vector<1x32xf32>
    %103 = vector.broadcast %95 : vector<1x32xf32> to vector<64x32xf32>
    %104 = arith.subf %91, %103 : vector<64x32xf32>
    %cst_24 = arith.constant 9.99999974E-6 : f32
    %105 = vector.broadcast %cst_24 : f32 to vector<1x32xf32>
    %106 = arith.addf %102, %105 : vector<1x32xf32>
    %107 = math.rsqrt %106 : vector<1x32xf32>
    %108 = vector.broadcast %107 : vector<1x32xf32> to vector<64x32xf32>
    %109 = arith.mulf %104, %108 : vector<64x32xf32>
    %110 = vector.broadcast %13 : vector<1x32xf32> to vector<64x32xf32>
    %111 = arith.mulf %109, %110 : vector<64x32xf32>
    %112 = vector.broadcast %14 : vector<1x32xf32> to vector<64x32xf32>
    %113 = arith.addf %111, %112 : vector<64x32xf32>
    %cst_25 = arith.constant 0.000000e+00 : f32
    %114 = vector.broadcast %cst_25 : f32 to vector<64x32xf32>
    %115 = arith.cmpf oge, %113, %114 : vector<64x32xf32>
    %cst_26 = arith.constant 1.000000e-01 : f32
    %116 = vector.broadcast %cst_26 : f32 to vector<64x32xf32>
    %117 = arith.mulf %116, %113 : vector<64x32xf32>
    %118 = arith.select %115, %113, %117 : vector<64x32xi1>, vector<64x32xf32>
    %cst_27 = arith.constant dense<0.000000e+00> : vector<64x32xf32>
    %119 = tpu.matmul %118, %15, %cst_27 {dimension_numbers = #tpu.dot_dimension_numbers<[1], [0], [0], [1], [0, 0, 1, 1], [], []>} : vector<64x32xf32>, vector<32x32xf32>, vector<64x32xf32> -> vector<64x32xf32>
    %cst_28 = arith.constant dense<0.000000e+00> : vector<64x32xf32>
    %120 = tpu.matmul %1, %119, %cst_28 {dimension_numbers = #tpu.dot_dimension_numbers<[1], [0], [0], [1], [0, 0, 1, 1], [], []>} : vector<64x64xf32>, vector<64x32xf32>, vector<64x32xf32> -> vector<64x32xf32>
    %121 = vector.broadcast %16 : vector<1x32xf32> to vector<64x32xf32>
    %122 = arith.addf %120, %121 : vector<64x32xf32>
    %cst_29 = arith.constant 0.000000e+00 : f32
    %123 = vector.broadcast %cst_29 : f32 to vector<64x32xf32>
    %124 = arith.cmpf oge, %122, %123 : vector<64x32xf32>
    %cst_30 = arith.constant 1.000000e-01 : f32
    %125 = vector.broadcast %cst_30 : f32 to vector<64x32xf32>
    %126 = arith.mulf %125, %122 : vector<64x32xf32>
    %127 = arith.select %124, %122, %126 : vector<64x32xi1>, vector<64x32xf32>
    %cst_31 = arith.constant dense<0.000000e+00> : vector<64x32xf32>
    %128 = tpu.matmul %1, %127, %cst_31 {dimension_numbers = #tpu.dot_dimension_numbers<[1], [0], [0], [1], [0, 0, 1, 1], [], []>} : vector<64x64xf32>, vector<64x32xf32>, vector<64x32xf32> -> vector<64x32xf32>
    %129 = vector.broadcast %17 : vector<1x32xf32> to vector<64x32xf32>
    %130 = arith.mulf %128, %129 : vector<64x32xf32>
    %cst_32 = arith.constant dense<0.000000e+00> : vector<64xf32>
    %131 = vector.multi_reduction <add>, %130, %cst_32 [1] : vector<64x32xf32> to vector<64xf32>
    %132 = vector.shape_cast %131 : vector<64xf32> to vector<64x1xf32>
    %133 = vector.broadcast %18 : vector<1x1xf32> to vector<64x1xf32>
    %134 = arith.addf %132, %133 : vector<64x1xf32>
    %135 = vector.shape_cast %134 : vector<64x1xf32> to vector<64x1xf32>
    %136 = vector.broadcast %135 : vector<64x1xf32> to vector<64x128xf32>
    %c0_33 = arith.constant 0 : index
    %c0_34 = arith.constant 0 : index
    %137 = vector.load %arg3[%c0_33, %c0_34] : memref<64x128xf32, #tpu.memory_space<vmem>>, vector<64x128xf32>
    tpu.vector_store %arg3[%c0_33, %c0_34], %136 {strides = array<i32>} : memref<64x128xf32, #tpu.memory_space<vmem>>, vector<64x128xf32>,
    return
  }
}

</mosaic_0001>

<bundles_post_ra>
// kernel: tpu_custom_call.1
= control target key start
LH: loop header
LB: loop body
LE: loop exit
PB: predicated region body
PF: predicated region fallthrough
CT: control target
= control target key end

     0   :  { %8 = vsyncpa [#allocation3], 0  ;;  %s1890_s0 = inlined_call_operand.vmem [shape: f32[64,2], index: 0, kind: input, shape index: {}]   ;;  %s1891_s1 = inlined_call_operand.vmem [shape: f32[64,64], index: 1, kind: input, shape index: {}]   ;;  %s1892_s2 = inlined_call_operand.hbm [shape: f32[88,128], index: 2, kind: input, shape index: {}]   ;;  %s1893_s3 = inlined_call_operand.hbm [shape: f32[64,128], index: 3, kind: output, shape index: {}]  }
   0x1   :  { %9 = vsyncpa [#allocation4], 0  ;;  %s1619_s12 = smov [#allocation2]   ;;  %s1571_s16 = scalar_lea.hbm %s1892_s2, 1408 }
   0x2   :  { %s19_s13 = sshll.u32 %s1619_s12, 4  ;;  %p1572_p0 = scmp.ne.s32.totalorder %s1892_s2, %s1571_s16  ;;  %s20_s13 = int_to_ptr.vmem [resolvable:$true] %s19_s13 }
   0x3   :  { %p1575_p1 = scmp.lt.u32.totalorder %s1571_s16, %s1892_s2 }
   0x5   :  { %p1577_p2 = pnand %p1575_p1, %p1572_p0 }
   0x7   :  { %1580 = shalt.err (!%p1577_p2)
}
   0x8   :  { %s1581_s21 = scalar_lea.vmem %s20_s13, 1408  ;;  %p1586_p4 = scmp.lt.s32.totalorder %s20_s13, %s20_s13 }
   0x9   :  { %p1582_p3 = scmp.ne.s32.totalorder %s20_s13, %s1581_s21  ;;  %p1587_p5 = scmp.lt.s32.totalorder %s1581_s21, %s1581_s21 }
   0xb   :  { %p1588_p6 = por %p1587_p5, %p1586_p4 }
   0xd   :  { %p1589_p7 = pnand %p1588_p6, %p1582_p3 }
   0xf   :  { %1592 = shalt.err (!%p1589_p7)
}
  0x10   :  { %s1620_s22 = smov 128   ;;  %s1621_s23 = smov 8  }
  0x11   :  { %25 = dma.hbm_to_vmem [thread:$0]  %s1892_s2, 1408, %s20_s13, [#allocation3], %s1620_s22, %s1620_s22, %s1621_s23  }
  0x12   :  { %1615 = dma.done.wait [#allocation3], 1408  }
  0x13   :  { %1616 = vsyncadd [#allocation3], 4294965888  ;;  %v1622_v0 = vmov 1   ;;  %v1623_v1 = vmov 0   ;;  %v29_v2 = vld [vmem:[%s1890_s0] sm:$0xff]  ;;  %v30_v3 = vld [vmem:[%s1890_s0 + $0x8] sm:$0xff]  ;;  %v96_v11 = vlaneseq }
  0x14   :  { %1563 = vset.pattern.permute.xlu1 %v1622_v0  ;;  %1562 = vset.pattern.permute.xlu0 %v1623_v1  ;;  %v31_v4 = vld [vmem:[%s1890_s0 + $0x10] sm:$0xff]  ;;  %v32_v5 = vld [vmem:[%s1890_s0 + $0x18] sm:$0xff]  ;;  %v33_v6 = vld [vmem:[%s1890_s0 + $0x20] sm:$0xff]  ;;  %vm172_vm0 = vcmask 64512   ;;  %vm425_vm9 = vcmask 130048  }
  0x15   :  { %109 = vperm.xlu1 %1563, %v29_v2   ;;  %58 = vperm.xlu0 %1562, %v29_v2   ;;  %v34_v7 = vld [vmem:[%s1890_s0 + $0x28] sm:$0xff]  ;;  %v35_v8 = vld [vmem:[%s1890_s0 + $0x30] sm:$0xff]  ;;  %v36_v9 = vld [vmem:[%s1890_s0 + $0x38] sm:$0xff]  ;;  %v1684_v12 = vshrl.u32 %v96_v11, 7 }
  0x16   :  { %v46_v10 = vld [vmem:[#allocation2 + $0x8] sm:$0xff]  ;;  %v1692_v17 = vld [vmem:[#allocation2] sm:$0xff] }
  0x17   :  { %1404 = vmatprep.subr.mxu0 %v46_v10  ;;  %1554 = vmatprep.subr.mxu1 %v46_v10  ;;  %v1687_v15 = vsub.s32 1, %v1684_v12  ;;  %v1690_v16 = vsub.s32 0, %v1684_v12  ;;  %v1699_v26 = vsub.s32 2, %v1684_v12 }
  0x18   :  { %1405 = vmatpush3.msra.mxu0 %v46_v10  ;;  %1555 = vmatpush3.msra.mxu1 %v46_v10 }
  0x19   :  { %113 = vperm.xlu1 %1563, %v30_v3   ;;  %63 = vperm.xlu0 %1562, %v30_v3   ;;  %v143_v20 = vrot.slane %v1692_v17, %v1687_v15  ;;  %v99_v21 = vrot.slane %v1692_v17, %v1690_v16  ;;  %v163_v36 = vrot.slane %v1692_v17, %v1699_v26 }
  0x1d   :  { %117 = vperm.xlu1 %1563, %v31_v4   ;;  %68 = vperm.xlu0 %1562, %v31_v4  }
  0x21   :  { %121 = vperm.xlu1 %1563, %v32_v5   ;;  %73 = vperm.xlu0 %1562, %v32_v5  }
  0x25   :  { %125 = vperm.xlu1 %1563, %v33_v6   ;;  %78 = vperm.xlu0 %1562, %v33_v6  }
  0x29   :  { %129 = vperm.xlu1 %1563, %v34_v7   ;;  %83 = vperm.xlu0 %1562, %v34_v7  }
  0x2d   :  { %133 = vperm.xlu1 %1563, %v35_v8   ;;  %88 = vperm.xlu0 %1562, %v35_v8  }
  0x31   :  { %137 = vperm.xlu1 %1563, %v36_v9   ;;  %93 = vperm.xlu0 %1562, %v36_v9  }
  0x35   :  { %1564 = vset.pattern.permute.xlu1 %v1623_v1 }
  0x94   :  { %v110_v13 = vpop.permute.xlu1 %109  ;;  %v59_v14 = vpop.permute.xlu0 %58 }
  0x95   :  { %v144_v27 = vmul.f32 %v143_v20, %v110_v13  ;;  %v100_v28 = vmul.f32 %v99_v21, %v59_v14 }
  0x97   :  { %v152_v37 = vadd.f32 %v144_v27, %v100_v28 }
  0x98   :  { %v114_v18 = vpop.permute.xlu1 %113  ;;  %v64_v19 = vpop.permute.xlu0 %63 }
  0x99   :  { %v145_v24 = vmul.f32 %v143_v20, %v114_v18  ;;  %v101_v25 = vmul.f32 %v99_v21, %v64_v19  ;;  %v164_v45 = vadd.f32 %v163_v36, %v152_v37 }
  0x9b   :  { %v153_v33 = vadd.f32 %v145_v24, %v101_v25  ;;  %v173_v54 = vsel %vm172_vm0, %v164_v45, 0.0 }
  0x9c   :  { %v118_v22 = vpop.permute.xlu1 %117  ;;  %v69_v23 = vpop.permute.xlu0 %68 }
  0x9d   :  { %v146_v29 = vmul.f32 %v143_v20, %v118_v22  ;;  %v102_v30 = vmul.f32 %v99_v21, %v69_v23  ;;  %v165_v41 = vadd.f32 %v163_v36, %v153_v33 }
  0x9f   :  { %v154_v38 = vadd.f32 %v146_v29, %v102_v30  ;;  %v174_v50 = vsel %vm172_vm0, %v165_v41, 0.0 }
  0xa0   :  { %v122_v31 = vpop.permute.xlu1 %121  ;;  %v74_v32 = vpop.permute.xlu0 %73  ;;  %v175_v58 = vadd.f32 %v174_v50, %v173_v54 }
  0xa1   :  { %v147_v34 = vmul.f32 %v143_v20, %v122_v31  ;;  %v103_v35 = vmul.f32 %v99_v21, %v74_v32  ;;  %v166_v46 = vadd.f32 %v163_v36, %v154_v38 }
  0xa3   :  { %v155_v42 = vadd.f32 %v147_v34, %v103_v35  ;;  %v176_v55 = vsel %vm172_vm0, %v166_v46, 0.0 }
  0xa4   :  { %v126_v39 = vpop.permute.xlu1 %125  ;;  %v79_v40 = vpop.permute.xlu0 %78  ;;  %v177_v1 = vadd.f32 %v176_v55, %v175_v58 }
  0xa5   :  { %v148_v43 = vmul.f32 %v143_v20, %v126_v39  ;;  %v104_v44 = vmul.f32 %v99_v21, %v79_v40  ;;  %v167_v51 = vadd.f32 %v163_v36, %v155_v42 }
  0xa7   :  { %v156_v47 = vadd.f32 %v148_v43, %v104_v44  ;;  %v178_v61 = vsel %vm172_vm0, %v167_v51, 0.0 }
  0xa8   :  { %v130_v48 = vpop.permute.xlu1 %129  ;;  %v84_v49 = vpop.permute.xlu0 %83  ;;  %v179_v4 = vadd.f32 %v178_v61, %v177_v1 }
  0xa9   :  { %v149_v52 = vmul.f32 %v143_v20, %v130_v48  ;;  %v105_v53 = vmul.f32 %v99_v21, %v84_v49  ;;  %v168_v56 = vadd.f32 %v163_v36, %v156_v47 }
  0xab   :  { %v157_v57 = vadd.f32 %v149_v52, %v105_v53  ;;  %v180_v2 = vsel %vm172_vm0, %v168_v56, 0.0 }
  0xac   :  { %v134_v59 = vpop.permute.xlu1 %133  ;;  %v89_v60 = vpop.permute.xlu0 %88  ;;  %v181_v11 = vadd.f32 %v180_v2, %v179_v4 }
  0xad   :  { %v169_v62 = vadd.f32 %v163_v36, %v157_v57  ;;  %v150_v63 = vmul.f32 %v143_v20, %v134_v59  ;;  %v106_v0 = vmul.f32 %v99_v21, %v89_v60 }
  0xaf   :  { %v158_v3 = vadd.f32 %v150_v63, %v106_v0  ;;  %v182_v7 = vsel %vm172_vm0, %v169_v62, 0.0 }
  0xb0   :  { %v138_v5 = vpop.permute.xlu1 %137  ;;  %v94_v6 = vpop.permute.xlu0 %93  ;;  %v183_v18 = vadd.f32 %v182_v7, %v181_v11  ;;  %v258_v7 = vsub.s32 4, %v1684_v12 }
  0xb1   :  { %v170_v8 = vadd.f32 %v163_v36, %v158_v3  ;;  %v151_v9 = vmul.f32 %v143_v20, %v138_v5  ;;  %v107_v10 = vmul.f32 %v99_v21, %v94_v6  ;;  %v246_v6 = vsub.s32 3, %v1684_v12 }
  0xb3   :  { %v184_v13 = vsel %vm172_vm0, %v170_v8, 0.0  ;;  %v159_v14 = vadd.f32 %v151_v9, %v107_v10  ;;  %v259_v10 = vrot.slane %v1692_v17, %v258_v7 }
  0xb4   :  { %v185_v22 = vadd.f32 %v184_v13, %v183_v18 }
  0xb5   :  { %v171_v19 = vadd.f32 %v163_v36, %v159_v14 }
  0xb7   :  { %v186_v23 = vsel %vm172_vm0, %v171_v19, 0.0 }
  0xb8   :  { %v187_v24 = vadd.f32 %v186_v23, %v185_v22 }
  0xba   :  { %v188_v25 = vrot.slane %v187_v24, 4 }
  0xbc   :  { %v189_v27 = vadd.f32 %v188_v25, %v187_v24 }
  0xbe   :  { %v190_v28 = vrot.slane %v189_v27, 2 }
  0xc0   :  { %v191_v29 = vadd.f32 %v190_v28, %v189_v27 }
  0xc2   :  { %v192_v30 = vrot.slane %v191_v29, 1 }
  0xc4   :  { %v193_v31 = vadd.f32 %v192_v30, %v191_v29 }
  0xc6   :  { %v195_v32 = vmul.f32 0.015625, %v193_v31 }
  0xc8   :  { %v196_v33 = vsub.f32 %v164_v45, %v195_v32  ;;  %v197_v20 = vsub.f32 %v165_v41, %v195_v32  ;;  %v198_v21 = vsub.f32 %v166_v46, %v195_v32  ;;  %v199_v34 = vsub.f32 %v167_v51, %v195_v32 }
  0xc9   :  { %v200_v35 = vsub.f32 %v168_v56, %v195_v32  ;;  %v201_v36 = vsub.f32 %v169_v62, %v195_v32  ;;  %v202_v47 = vsub.f32 %v170_v8, %v195_v32  ;;  %v203_v45 = vsub.f32 %v171_v19, %v195_v32 }
  0xca   :  { %v204_v37 = vmul.f32 %v196_v33, %v196_v33  ;;  %v205_v38 = vmul.f32 %v197_v20, %v197_v20  ;;  %v206_v39 = vmul.f32 %v198_v21, %v198_v21  ;;  %v207_v40 = vmul.f32 %v199_v34, %v199_v34 }
  0xcb   :  { %v208_v48 = vmul.f32 %v200_v35, %v200_v35  ;;  %v209_v41 = vmul.f32 %v201_v36, %v201_v36  ;;  %v210_v52 = vmul.f32 %v202_v47, %v202_v47  ;;  %v211_v55 = vmul.f32 %v203_v45, %v203_v45 }
  0xcc   :  { %v212_v42 = vsel %vm172_vm0, %v204_v37, 0.0  ;;  %v213_v43 = vsel %vm172_vm0, %v205_v38, 0.0  ;;  %v215_v49 = vsel %vm172_vm0, %v206_v39, 0.0  ;;  %v217_v46 = vsel %vm172_vm0, %v207_v40, 0.0 }
  0xcd   :  { %v214_v44 = vadd.f32 %v213_v43, %v212_v42  ;;  %v219_v53 = vsel %vm172_vm0, %v208_v48, 0.0  ;;  %v221_v56 = vsel %vm172_vm0, %v209_v41, 0.0  ;;  %v223_v58 = vsel %vm172_vm0, %v210_v52, 0.0 }
  0xce   :  { %v225_v60 = vsel %vm172_vm0, %v211_v55, 0.0  ;;  %v247_v8 = vrot.slane %v1692_v17, %v246_v6  ;;  %v49_v55 = vld [vmem:[#allocation2 + $0x20] sm:$0xff] }
  0xcf   :  { %v216_v50 = vadd.f32 %v215_v49, %v214_v44 }
  0xd1   :  { %v218_v51 = vadd.f32 %v217_v46, %v216_v50 }
  0xd3   :  { %v220_v54 = vadd.f32 %v219_v53, %v218_v51 }
  0xd5   :  { %v222_v57 = vadd.f32 %v221_v56, %v220_v54  ;;  %v48_v54 = vld [vmem:[#allocation2 + $0x18] sm:$0xff] }
  0xd6   :  { %v1510_v56 = vpack.c.bf16 %v49_v55, %v48_v54 }
  0xd7   :  { %v224_v59 = vadd.f32 %v223_v58, %v222_v57  ;;  %v1731_v57 = vld [vmem:[#allocation2 + $0x10] sm:$0xff] }
  0xd8   :  { %1511 = vmatprep.subr.bf16.mxu1 %v1510_v56  ;;  %v295_v58 = vrot.slane %v1731_v57, %v1690_v16 }
  0xd9   :  { %v226_v61 = vadd.f32 %v225_v60, %v224_v59 }
  0xdb   :  { %v227_v62 = vrot.slane %v226_v61, 4 }
  0xdd   :  { %v228_v63 = vadd.f32 %v227_v62, %v226_v61 }
  0xdf   :  { %v229_v0 = vrot.slane %v228_v63, 2 }
  0xe1   :  { %v230_v1 = vadd.f32 %v229_v0, %v228_v63 }
  0xe3   :  { %v231_v2 = vrot.slane %v230_v1, 1 }
  0xe5   :  { %v232_v3 = vadd.f32 %v231_v2, %v230_v1 }
  0xe7   :  { %v233_v4 = vmul.f32 0.015625, %v232_v3 }
  0xe9   :  { %v234_v5 = vadd.f32 1e-05, %v233_v4 }
  0xeb   :  { %1565 = vrsqrt.f32 %v234_v5 }
  0xf5   :  { %v1566_v9 = vpop.eup %1565 }
  0xf6   :  { %v243_v11 = vmul.f32 %v1566_v9, %v203_v45  ;;  %v236_v13 = vmul.f32 %v1566_v9, %v196_v33  ;;  %v240_v14 = vmul.f32 %v1566_v9, %v200_v35  ;;  %v237_v18 = vmul.f32 %v1566_v9, %v197_v20 }
  0xf7   :  { %v241_v19 = vmul.f32 %v1566_v9, %v201_v36  ;;  %v238_v22 = vmul.f32 %v1566_v9, %v198_v21  ;;  %v242_v23 = vmul.f32 %v1566_v9, %v202_v47  ;;  %v239_v24 = vmul.f32 %v1566_v9, %v199_v34 }
  0xf8   :  { %v248_v25 = vmul.f32 %v247_v8, %v236_v13  ;;  %v252_v27 = vmul.f32 %v247_v8, %v240_v14  ;;  %v249_v28 = vmul.f32 %v247_v8, %v237_v18  ;;  %v255_v29 = vmul.f32 %v247_v8, %v243_v11 }
  0xf9   :  { %v253_v30 = vmul.f32 %v247_v8, %v241_v19  ;;  %v250_v31 = vmul.f32 %v247_v8, %v238_v22  ;;  %v254_v12 = vmul.f32 %v247_v8, %v242_v23  ;;  %v251_v32 = vmul.f32 %v247_v8, %v239_v24 }
  0xfa   :  { %v260_v37 = vadd.f32 %v259_v10, %v248_v25  ;;  %v264_v38 = vadd.f32 %v259_v10, %v252_v27  ;;  %v261_v39 = vadd.f32 %v259_v10, %v249_v28  ;;  %v267_v17 = vadd.f32 %v259_v10, %v255_v29 }
  0xfb   :  { %v265_v40 = vadd.f32 %v259_v10, %v253_v30  ;;  %v262_v33 = vadd.f32 %v259_v10, %v250_v31  ;;  %v266_v35 = vadd.f32 %v259_v10, %v254_v12  ;;  %v263_v20 = vadd.f32 %v259_v10, %v251_v32 }
  0xfc   :  { %vm268_vm1 = vcmp.ge.f32.partialorder %v260_v37, 0.0  ;;  %v276_v21 = vmul.f32 0.1, %v260_v37  ;;  %vm272_vm2 = vcmp.ge.f32.partialorder %v264_v38, 0.0  ;;  %v280_v34 = vmul.f32 0.1, %v264_v38 }
  0xfd   :  { %vm269_vm3 = vcmp.ge.f32.partialorder %v261_v39, 0.0  ;;  %v277_v36 = vmul.f32 0.1, %v261_v39  ;;  %vm273_vm4 = vcmp.ge.f32.partialorder %v265_v40, 0.0  ;;  %v281_v42 = vmul.f32 0.1, %v265_v40 }
  0xfe   :  { %v284_v43 = vsel %vm268_vm1, %v260_v37, %v276_v21  ;;  %v288_v44 = vsel %vm272_vm2, %v264_v38, %v280_v34  ;;  %vm270_vm5 = vcmp.ge.f32.partialorder %v262_v33, 0.0  ;;  %v278_v47 = vmul.f32 0.1, %v262_v33 }
  0xff   :  { %1406 = vmatprep.mubr.msk.f32.mxu0 %vm172_vm0, %v284_v43  ;;  %1412 = vmatprep.mubr.msk.f32.mxu1 %vm172_vm0, %v288_v44  ;;  %v285_v48 = vsel %vm269_vm3, %v261_v39, %v277_v36  ;;  %v289_v49 = vsel %vm273_vm4, %v265_v40, %v281_v42  ;;  %vm274_vm6 = vcmp.ge.f32.partialorder %v266_v35, 0.0  ;;  %v282_v50 = vmul.f32 0.1, %v266_v35 }
 0x100   :  { %1407 = vmatmul.mubr.msk.f32.vlgmr.msra.gmra.mrb[0].mxu0 %vm172_vm0, %v285_v48  ;;  %1413 = vmatmul.mubr.msk.f32.vlgmr.msra.gmra.mrb[0].mxu1 %vm172_vm0, %v289_v49  ;;  %v286_v45 = vsel %vm270_vm5, %v262_v33, %v278_v47  ;;  %vm271_vm7 = vcmp.ge.f32.partialorder %v263_v20, 0.0  ;;  %v279_v41 = vmul.f32 0.1, %v263_v20  ;;  %vm275_vm8 = vcmp.ge.f32.partialorder %v267_v17, 0.0 }
 0x101   :  { %1409 = vmatprep.mubr.msk.f32.mxu0 %vm172_vm0, %v286_v45  ;;  %v290_v46 = vsel %vm274_vm6, %v266_v35, %v282_v50  ;;  %v283_v51 = vmul.f32 0.1, %v267_v17  ;;  %1513 = vmatpush3.bf16.msra.mxu1 %v1510_v56  ;;  %vm677_vm2 = vcmask 261120  }
 0x102   :  { %1415 = vmatprep.mubr.msk.f32.mxu1 %vm172_vm0, %v290_v46  ;;  %v287_v52 = vsel %vm271_vm7, %v263_v20, %v279_v41 }
 0x103   :  { %v291_v53 = vsel %vm275_vm8, %v267_v17, %v283_v51 }
 0x104   :  { %1410 = vmatmul.mubr.msk.f32.gmra.mrb[2].mxu0 %vm172_vm0, %v287_v52  ;;  %1416 = vmatmul.mubr.msk.f32.gmra.mrb[2].mxu1 %vm172_vm0, %v291_v53 }
 0x1d3   :  { %v1408_v59 = vpop.f32.mrb[0].mxu0  ;;  %v1414_v60 = vpop.f32.mrb[0].mxu1 }
 0x1d4   :  { %v392_v61 = vadd.f32 %v1408_v59, %v295_v58  ;;  %v386_v62 = vpop.f32.mrb[1].mxu0  ;;  %v406_v63 = vpop.f32.mrb[1].mxu1  ;;  %v412_v14 = vadd.f32 %v1414_v60, %v295_v58 }
 0x1d5   :  { %v387_v0 = vadd.f32 %v386_v62, %v295_v58  ;;  %v407_v10 = vadd.f32 %v406_v63, %v295_v58 }
 0x1d6   :  { %v427_v1 = vsel %vm425_vm9, %v392_v61, 0.0  ;;  %v435_v25 = vsel %vm425_vm9, %v412_v14, 0.0 }
 0x1d7   :  { %v426_v2 = vsel %vm425_vm9, %v387_v0, 0.0  ;;  %v1411_v3 = vpop.f32.mrb[2].mxu0  ;;  %v1417_v4 = vpop.f32.mrb[2].mxu1  ;;  %v433_v22 = vsel %vm425_vm9, %v407_v10, 0.0 }
 0x1d8   :  { %v428_v5 = vadd.f32 %v427_v1, %v426_v2  ;;  %v396_v6 = vpop.f32.mrb[3].mxu0  ;;  %v416_v7 = vpop.f32.mrb[3].mxu1  ;;  %v402_v8 = vadd.f32 %v1411_v3, %v295_v58  ;;  %v422_v27 = vadd.f32 %v1417_v4, %v295_v58 }
 0x1d9   :  { %v397_v9 = vadd.f32 %v396_v6, %v295_v58  ;;  %v417_v23 = vadd.f32 %v416_v7, %v295_v58 }
 0x1da   :  { %v431_v18 = vsel %vm425_vm9, %v402_v8, 0.0  ;;  %v439_v31 = vsel %vm425_vm9, %v422_v27, 0.0 }
 0x1db   :  { %v429_v11 = vsel %vm425_vm9, %v397_v9, 0.0  ;;  %v437_v29 = vsel %vm425_vm9, %v417_v23, 0.0 }
 0x1dc   :  { %v430_v13 = vadd.f32 %v429_v11, %v428_v5 }
 0x1de   :  { %v432_v19 = vadd.f32 %v431_v18, %v430_v13  ;;  %v499_v13 = vrot.slane %v1731_v57, %v1687_v15  ;;  %v511_v18 = vrot.slane %v1731_v57, %v1699_v26 }
 0x1e0   :  { %v434_v24 = vadd.f32 %v433_v22, %v432_v19 }
 0x1e2   :  { %v436_v28 = vadd.f32 %v435_v25, %v434_v24 }
 0x1e4   :  { %v438_v30 = vadd.f32 %v437_v29, %v436_v28 }
 0x1e6   :  { %v440_v12 = vadd.f32 %v439_v31, %v438_v30 }
 0x1e8   :  { %v441_v32 = vrot.slane %v440_v12, 4 }
 0x1ea   :  { %v442_v37 = vadd.f32 %v441_v32, %v440_v12 }
 0x1ec   :  { %v443_v38 = vrot.slane %v442_v37, 2 }
 0x1ee   :  { %v444_v39 = vadd.f32 %v443_v38, %v442_v37 }
 0x1f0   :  { %v445_v17 = vrot.slane %v444_v39, 1 }
 0x1f2   :  { %v446_v40 = vadd.f32 %v445_v17, %v444_v39 }
 0x1f4   :  { %v447_v33 = vmul.f32 0.015625, %v446_v40 }
 0x1f6   :  { %v448_v35 = vsub.f32 %v387_v0, %v447_v33  ;;  %v449_v20 = vsub.f32 %v392_v61, %v447_v33  ;;  %v450_v21 = vsub.f32 %v397_v9, %v447_v33  ;;  %v451_v34 = vsub.f32 %v402_v8, %v447_v33 }
 0x1f7   :  { %v452_v36 = vsub.f32 %v407_v10, %v447_v33  ;;  %v453_v42 = vsub.f32 %v412_v14, %v447_v33  ;;  %v454_v43 = vsub.f32 %v417_v23, %v447_v33  ;;  %v455_v44 = vsub.f32 %v422_v27, %v447_v33 }
 0x1f8   :  { %v456_v47 = vmul.f32 %v448_v35, %v448_v35  ;;  %v457_v48 = vmul.f32 %v449_v20, %v449_v20  ;;  %v458_v49 = vmul.f32 %v450_v21, %v450_v21  ;;  %v459_v50 = vmul.f32 %v451_v34, %v451_v34 }
 0x1f9   :  { %v460_v51 = vmul.f32 %v452_v36, %v452_v36  ;;  %v461_v54 = vmul.f32 %v453_v42, %v453_v42  ;;  %v462_v58 = vmul.f32 %v454_v43, %v454_v43  ;;  %v463_v61 = vmul.f32 %v455_v44, %v455_v44 }
 0x1fa   :  { %v464_v45 = vsel %vm425_vm9, %v456_v47, 0.0  ;;  %v465_v41 = vsel %vm425_vm9, %v457_v48, 0.0  ;;  %v467_v52 = vsel %vm425_vm9, %v458_v49, 0.0  ;;  %v469_v55 = vsel %vm425_vm9, %v459_v50, 0.0 }
 0x1fb   :  { %v466_v46 = vadd.f32 %v465_v41, %v464_v45  ;;  %v471_v59 = vsel %vm425_vm9, %v460_v51, 0.0  ;;  %v473_v62 = vsel %vm425_vm9, %v461_v54, 0.0  ;;  %v475_v0 = vsel %vm425_vm9, %v462_v58, 0.0  ;;  %v51_v58 = vld [vmem:[#allocation2 + $0x30] sm:$0xff] }
 0x1fc   :  { %v477_v2 = vsel %vm425_vm9, %v463_v61, 0.0 }
 0x1fd   :  { %v468_v53 = vadd.f32 %v467_v52, %v466_v46 }
 0x1ff   :  { %v470_v56 = vadd.f32 %v469_v55, %v468_v53 }
 0x201   :  { %v472_v60 = vadd.f32 %v471_v59, %v470_v56  ;;  %v52_v59 = vld [vmem:[#allocation2 + $0x38] sm:$0xff] }
 0x202   :  { %v1514_v61 = vpack.c.bf16 %v52_v59, %v51_v58 }
 0x203   :  { %v474_v63 = vadd.f32 %v473_v62, %v472_v60  ;;  %v53_v60 = vld [vmem:[#allocation2 + $0x40] sm:$0xff]  ;;  %v54_v62 = vld [vmem:[#allocation2 + $0x48] sm:$0xff] }
 0x204   :  { %1515 = vmatprep.subr.bf16.mxu0 %v1514_v61 }
 0x205   :  { %v476_v1 = vadd.f32 %v475_v0, %v474_v63  ;;  %v1518_v63 = vpack.c.bf16 %v54_v62, %v53_v60  ;;  %1517 = vmatpush3.bf16.msra.mxu0 %v1514_v61  ;;  %v1763_v0 = vld [vmem:[#allocation2 + $0x28] sm:$0xff] }
 0x207   :  { %v478_v3 = vadd.f32 %v477_v2, %v476_v1  ;;  %1519 = vmatprep.subr.bf16.mxu0 %v1518_v63  ;;  %v547_v1 = vrot.slane %v1763_v0, %v1690_v16 }
 0x209   :  { %v479_v4 = vrot.slane %v478_v3, 4  ;;  %1521 = vmatpush3.bf16.msra.mxu0 %v1518_v63 }
 0x20b   :  { %v480_v5 = vadd.f32 %v479_v4, %v478_v3 }
 0x20d   :  { %v481_v6 = vrot.slane %v480_v5, 2 }
 0x20f   :  { %v482_v7 = vadd.f32 %v481_v6, %v480_v5 }
 0x211   :  { %v483_v8 = vrot.slane %v482_v7, 1 }
 0x213   :  { %v484_v9 = vadd.f32 %v483_v8, %v482_v7 }
 0x215   :  { %v485_v10 = vmul.f32 0.015625, %v484_v9 }
 0x217   :  { %v486_v11 = vadd.f32 1e-05, %v485_v10 }
 0x219   :  { %1567 = vrsqrt.f32 %v486_v11 }
 0x223   :  { %v1568_v14 = vpop.eup %1567 }
 0x224   :  { %v494_v19 = vmul.f32 %v1568_v14, %v454_v43  ;;  %v488_v22 = vmul.f32 %v1568_v14, %v448_v35  ;;  %v489_v23 = vmul.f32 %v1568_v14, %v449_v20  ;;  %v490_v24 = vmul.f32 %v1568_v14, %v450_v21 }
 0x225   :  { %v491_v25 = vmul.f32 %v1568_v14, %v451_v34  ;;  %v492_v27 = vmul.f32 %v1568_v14, %v452_v36  ;;  %v493_v28 = vmul.f32 %v1568_v14, %v453_v42  ;;  %v495_v29 = vmul.f32 %v1568_v14, %v455_v44 }
 0x226   :  { %v500_v30 = vmul.f32 %v499_v13, %v488_v22  ;;  %v501_v31 = vmul.f32 %v499_v13, %v489_v23  ;;  %v502_v12 = vmul.f32 %v499_v13, %v490_v24  ;;  %v506_v40 = vmul.f32 %v499_v13, %v494_v19 }
 0x227   :  { %v503_v32 = vmul.f32 %v499_v13, %v491_v25  ;;  %v504_v37 = vmul.f32 %v499_v13, %v492_v27  ;;  %v505_v57 = vmul.f32 %v499_v13, %v493_v28  ;;  %v507_v44 = vmul.f32 %v499_v13, %v495_v29 }
 0x228   :  { %v512_v38 = vadd.f32 %v511_v18, %v500_v30  ;;  %v513_v39 = vadd.f32 %v511_v18, %v501_v31  ;;  %v514_v17 = vadd.f32 %v511_v18, %v502_v12  ;;  %v518_v50 = vadd.f32 %v511_v18, %v506_v40 }
 0x229   :  { %v515_v33 = vadd.f32 %v511_v18, %v503_v32  ;;  %v516_v47 = vadd.f32 %v511_v18, %v504_v37  ;;  %v517_v43 = vadd.f32 %v511_v18, %v505_v57  ;;  %v519_v46 = vadd.f32 %v511_v18, %v507_v44 }
 0x22a   :  { %vm520_vm10 = vcmp.ge.f32.partialorder %v512_v38, 0.0  ;;  %v528_v35 = vmul.f32 0.1, %v512_v38  ;;  %vm521_vm11 = vcmp.ge.f32.partialorder %v513_v39, 0.0  ;;  %v529_v20 = vmul.f32 0.1, %v513_v39 }
 0x22b   :  { %vm522_vm12 = vcmp.ge.f32.partialorder %v514_v17, 0.0  ;;  %v530_v21 = vmul.f32 0.1, %v514_v17  ;;  %v531_v42 = vmul.f32 0.1, %v515_v33  ;;  %vm523_vm13 = vcmp.ge.f32.partialorder %v515_v33, 0.0 }
 0x22c   :  { %v536_v34 = vsel %vm520_vm10, %v512_v38, %v528_v35  ;;  %v537_v36 = vsel %vm521_vm11, %v513_v39, %v529_v20  ;;  %v532_v49 = vmul.f32 0.1, %v516_v47  ;;  %vm524_vm14 = vcmp.ge.f32.partialorder %v516_v47, 0.0 }
 0x22d   :  { %1422 = vmatprep.mubr.msk.f32.mxu1 %vm425_vm9, %v536_v34  ;;  %v538_v48 = vsel %vm522_vm12, %v514_v17, %v530_v21  ;;  %v539_v45 = vsel %vm523_vm13, %v515_v33, %v531_v42  ;;  %v533_v41 = vmul.f32 0.1, %v517_v43  ;;  %vm525_vm15 = vcmp.ge.f32.partialorder %v517_v43, 0.0 }
 0x22e   :  { %1423 = vmatmul.mubr.msk.f32.vlgmr.msra.gmra.mrb[4].mxu1 %vm425_vm9, %v537_v36  ;;  %v540_v51 = vsel %vm524_vm14, %v516_v47, %v532_v49  ;;  %v534_v52 = vmul.f32 0.1, %v518_v50  ;;  %vm526_vm0 = vcmp.ge.f32.partialorder %v518_v50, 0.0  ;;  %v535_v54 = vmul.f32 0.1, %v519_v46 }
 0x22f   :  { %1425 = vmatprep.mubr.msk.f32.mxu1 %vm425_vm9, %v538_v48  ;;  %v541_v53 = vsel %vm525_vm15, %v517_v43, %v533_v41  ;;  %vm527_vm1 = vcmp.ge.f32.partialorder %v519_v46, 0.0  ;;  %vm929_vm11 = vcmask 523264  }
 0x230   :  { %v542_v55 = vsel %vm526_vm0, %v518_v50, %v534_v52  ;;  %v543_v56 = vsel %vm527_vm1, %v519_v46, %v535_v54 }
 0x232   :  { %1426 = vmatmul.mubr.msk.f32.gmra.mrb[6].mxu1 %vm425_vm9, %v539_v45 }
 0x233   :  { %1428 = vmatprep.mubr.msk.f32.mxu1 %vm425_vm9, %v540_v51 }
 0x236   :  { %1429 = vmatmul.mubr.msk.f32.gmra.mrb[8].mxu1 %vm425_vm9, %v541_v53 }
 0x237   :  { %1431 = vmatprep.mubr.msk.f32.mxu1 %vm425_vm9, %v542_v55 }
 0x23a   :  { %1432 = vmatmul.mubr.msk.f32.gmra.mrb[10].mxu1 %vm425_vm9, %v543_v56 }
 0x301   :  { %v1424_v2 = vpop.f32.mrb[4].mxu1 }
 0x302   :  { %v644_v3 = vadd.f32 %v1424_v2, %v547_v1  ;;  %v638_v4 = vpop.f32.mrb[5].mxu1 }
 0x303   :  { %v639_v5 = vadd.f32 %v638_v4, %v547_v1 }
 0x304   :  { %v679_v6 = vsel %vm677_vm2, %v644_v3, 0.0 }
 0x305   :  { %v678_v7 = vsel %vm677_vm2, %v639_v5, 0.0  ;;  %v1427_v8 = vpop.f32.mrb[6].mxu1 }
 0x306   :  { %v680_v9 = vadd.f32 %v679_v6, %v678_v7  ;;  %v648_v10 = vpop.f32.mrb[7].mxu1  ;;  %v654_v11 = vadd.f32 %v1427_v8, %v547_v1 }
 0x307   :  { %v649_v13 = vadd.f32 %v648_v10, %v547_v1 }
 0x308   :  { %v683_v23 = vsel %vm677_vm2, %v654_v11, 0.0 }
 0x309   :  { %v681_v14 = vsel %vm677_vm2, %v649_v13, 0.0  ;;  %v1430_v18 = vpop.f32.mrb[8].mxu1 }
 0x30a   :  { %v682_v19 = vadd.f32 %v681_v14, %v680_v9  ;;  %v658_v22 = vpop.f32.mrb[9].mxu1  ;;  %v664_v24 = vadd.f32 %v1430_v18, %v547_v1 }
 0x30b   :  { %v659_v25 = vadd.f32 %v658_v22, %v547_v1 }
 0x30c   :  { %v684_v27 = vadd.f32 %v683_v23, %v682_v19  ;;  %v687_v12 = vsel %vm677_vm2, %v664_v24, 0.0 }
 0x30d   :  { %v685_v28 = vsel %vm677_vm2, %v659_v25, 0.0  ;;  %v1433_v29 = vpop.f32.mrb[10].mxu1 }
 0x30e   :  { %v686_v30 = vadd.f32 %v685_v28, %v684_v27  ;;  %v668_v31 = vpop.f32.mrb[11].mxu1  ;;  %v674_v32 = vadd.f32 %v1433_v29, %v547_v1  ;;  %v763_v28 = vrot.slane %v1763_v0, %v1699_v26 }
 0x30f   :  { %v669_v37 = vadd.f32 %v668_v31, %v547_v1 }
 0x310   :  { %v688_v38 = vadd.f32 %v687_v12, %v686_v30  ;;  %v691_v40 = vsel %vm677_vm2, %v674_v32, 0.0 }
 0x311   :  { %v689_v39 = vsel %vm677_vm2, %v669_v37, 0.0 }
 0x312   :  { %v690_v17 = vadd.f32 %v689_v39, %v688_v38 }
 0x314   :  { %v692_v33 = vadd.f32 %v691_v40, %v690_v17 }
 0x316   :  { %v693_v47 = vrot.slane %v692_v33, 4 }
 0x318   :  { %v694_v57 = vadd.f32 %v693_v47, %v692_v33 }
 0x31a   :  { %v695_v35 = vrot.slane %v694_v57, 2 }
 0x31c   :  { %v696_v20 = vadd.f32 %v695_v35, %v694_v57 }
 0x31e   :  { %v697_v21 = vrot.slane %v696_v20, 1 }
 0x320   :  { %v698_v34 = vadd.f32 %v697_v21, %v696_v20 }
 0x322   :  { %v699_v36 = vmul.f32 0.015625, %v698_v34 }
 0x324   :  { %v700_v42 = vsub.f32 %v639_v5, %v699_v36  ;;  %v701_v43 = vsub.f32 %v644_v3, %v699_v36  ;;  %v702_v44 = vsub.f32 %v649_v13, %v699_v36  ;;  %v703_v48 = vsub.f32 %v654_v11, %v699_v36 }
 0x325   :  { %v704_v49 = vsub.f32 %v659_v25, %v699_v36  ;;  %v705_v50 = vsub.f32 %v664_v24, %v699_v36  ;;  %v706_v45 = vsub.f32 %v669_v37, %v699_v36  ;;  %v707_v41 = vsub.f32 %v674_v32, %v699_v36 }
 0x326   :  { %v708_v46 = vmul.f32 %v700_v42, %v700_v42  ;;  %v709_v51 = vmul.f32 %v701_v43, %v701_v43  ;;  %v710_v52 = vmul.f32 %v702_v44, %v702_v44  ;;  %v711_v53 = vmul.f32 %v703_v48, %v703_v48 }
 0x327   :  { %v712_v58 = vmul.f32 %v704_v49, %v704_v49  ;;  %v713_v61 = vmul.f32 %v705_v50, %v705_v50  ;;  %v714_v1 = vmul.f32 %v706_v45, %v706_v45  ;;  %v715_v4 = vmul.f32 %v707_v41, %v707_v41 }
 0x328   :  { %v716_v54 = vsel %vm677_vm2, %v708_v46, 0.0  ;;  %v717_v55 = vsel %vm677_vm2, %v709_v51, 0.0  ;;  %v719_v59 = vsel %vm677_vm2, %v710_v52, 0.0  ;;  %v721_v62 = vsel %vm677_vm2, %v711_v53, 0.0 }
 0x329   :  { %v718_v56 = vadd.f32 %v717_v55, %v716_v54  ;;  %v723_v2 = vsel %vm677_vm2, %v712_v58, 0.0  ;;  %v725_v5 = vsel %vm677_vm2, %v713_v61, 0.0  ;;  %v727_v7 = vsel %vm677_vm2, %v714_v1, 0.0  ;;  %v37_v1 = vld [vmem:[%s1891_s1] sm:$0xff] }
 0x32a   :  { %v729_v9 = vsel %vm677_vm2, %v715_v4, 0.0  ;;  %v751_v25 = vrot.slane %v1763_v0, %v1687_v15  ;;  %1470 = vmatprep.mubr.msk.f32.mxu1 %vm929_vm11, %v37_v1 }
 0x32b   :  { %v720_v60 = vadd.f32 %v719_v59, %v718_v56 }
 0x32d   :  { %v722_v63 = vadd.f32 %v721_v62, %v720_v60 }
 0x32f   :  { %v724_v3 = vadd.f32 %v723_v2, %v722_v63 }
 0x331   :  { %v726_v6 = vadd.f32 %v725_v5, %v724_v3 }
 0x333   :  { %v728_v8 = vadd.f32 %v727_v7, %v726_v6 }
 0x335   :  { %v730_v10 = vadd.f32 %v729_v9, %v728_v8 }
 0x337   :  { %v731_v11 = vrot.slane %v730_v10, 4 }
 0x339   :  { %v732_v13 = vadd.f32 %v731_v11, %v730_v10 }
 0x33b   :  { %v733_v14 = vrot.slane %v732_v13, 2 }
 0x33d   :  { %v734_v18 = vadd.f32 %v733_v14, %v732_v13 }
 0x33f   :  { %v735_v19 = vrot.slane %v734_v18, 1 }
 0x341   :  { %v736_v22 = vadd.f32 %v735_v19, %v734_v18  ;;  %v1803_v18 = vld [vmem:[%s1891_s1 + $0x8] sm:$0xff]  ;;  %v1808_v19 = vld [vmem:[%s1891_s1 + $0x10] sm:$0xff] }
 0x343   :  { %v737_v23 = vmul.f32 0.015625, %v736_v22  ;;  %v1817_v22 = vld [vmem:[%s1891_s1 + $0x18] sm:$0xff] }
 0x345   :  { %v738_v24 = vadd.f32 1e-05, %v737_v23  ;;  %v1822_v23 = vld [vmem:[%s1891_s1 + $0x20] sm:$0xff] }
 0x347   :  { %1569 = vrsqrt.f32 %v738_v24  ;;  %v1831_v24 = vld [vmem:[%s1891_s1 + $0x28] sm:$0xff] }
 0x351   :  { %v1570_v27 = vpop.eup %1569 }
 0x352   :  { %v746_v29 = vmul.f32 %v1570_v27, %v706_v45  ;;  %v740_v30 = vmul.f32 %v1570_v27, %v700_v42  ;;  %v741_v31 = vmul.f32 %v1570_v27, %v701_v43  ;;  %v742_v12 = vmul.f32 %v1570_v27, %v702_v44 }
 0x353   :  { %v743_v32 = vmul.f32 %v1570_v27, %v703_v48  ;;  %v744_v37 = vmul.f32 %v1570_v27, %v704_v49  ;;  %v745_v38 = vmul.f32 %v1570_v27, %v705_v50  ;;  %v747_v39 = vmul.f32 %v1570_v27, %v707_v41  ;;  %v44_v27 = vld [vmem:[%s1891_s1 + $0x38] sm:$0xff] }
 0x354   :  { %v752_v17 = vmul.f32 %v751_v25, %v740_v30  ;;  %v753_v40 = vmul.f32 %v751_v25, %v741_v31  ;;  %v754_v33 = vmul.f32 %v751_v25, %v742_v12  ;;  %v758_v34 = vmul.f32 %v751_v25, %v746_v29 }
 0x355   :  { %v755_v47 = vmul.f32 %v751_v25, %v743_v32  ;;  %v756_v57 = vmul.f32 %v751_v25, %v744_v37  ;;  %v757_v0 = vmul.f32 %v751_v25, %v745_v38  ;;  %v759_v41 = vmul.f32 %v751_v25, %v747_v39  ;;  %v1836_v25 = vld [vmem:[%s1891_s1 + $0x30] sm:$0xff]  ;;  %s1624_s1 = smov [#allocation5]  }
 0x356   :  { %v764_v35 = vadd.f32 %v763_v28, %v752_v17  ;;  %v765_v20 = vadd.f32 %v763_v28, %v753_v40  ;;  %v766_v21 = vadd.f32 %v763_v28, %v754_v33  ;;  %v770_v53 = vadd.f32 %v763_v28, %v758_v34  ;;  %s1289_s2 = sshll.u32 %s1624_s1, 4  ;;  %s1290_s2 = int_to_ptr.vmem [resolvable:$true] %s1289_s2 }
 0x357   :  { %v767_v36 = vadd.f32 %v763_v28, %v755_v47  ;;  %v768_v46 = vadd.f32 %v763_v28, %v756_v57  ;;  %v769_v45 = vadd.f32 %v763_v28, %v757_v0  ;;  %v771_v56 = vadd.f32 %v763_v28, %v759_v41  ;;  %v1846_v28 = vld [vmem:[#allocation2 + $0x50] sm:$0xff]  ;;  %s1593_s4 = scalar_lea.vmem %s1290_s2, 1024  ;;  %p1598_p9 = scmp.lt.s32.totalorder %s1290_s2, %s1290_s2 }
 0x358   :  { %vm772_vm3 = vcmp.ge.f32.partialorder %v764_v35, 0.0  ;;  %v780_v42 = vmul.f32 0.1, %v764_v35  ;;  %vm773_vm4 = vcmp.ge.f32.partialorder %v765_v20, 0.0  ;;  %v781_v43 = vmul.f32 0.1, %v765_v20  ;;  %p1594_p8 = scmp.ne.s32.totalorder %s1290_s2, %s1593_s4  ;;  %p1599_p10 = scmp.lt.s32.totalorder %s1593_s4, %s1593_s4 }
 0x359   :  { %vm774_vm5 = vcmp.ge.f32.partialorder %v766_v21, 0.0  ;;  %v782_v44 = vmul.f32 0.1, %v766_v21  ;;  %v783_v50 = vmul.f32 0.1, %v767_v36  ;;  %vm775_vm6 = vcmp.ge.f32.partialorder %v767_v36, 0.0 }
 0x35a   :  { %v788_v48 = vsel %vm772_vm3, %v764_v35, %v780_v42  ;;  %v789_v49 = vsel %vm773_vm4, %v765_v20, %v781_v43  ;;  %v784_v52 = vmul.f32 0.1, %v768_v46  ;;  %vm776_vm7 = vcmp.ge.f32.partialorder %v768_v46, 0.0  ;;  %p1600_p11 = por %p1599_p10, %p1598_p9 }
 0x35b   :  { %1442 = vmatprep.mubr.msk.f32.mxu0 %vm677_vm2, %v788_v48  ;;  %v790_v51 = vsel %vm774_vm5, %v766_v21, %v782_v44  ;;  %v791_v54 = vsel %vm775_vm6, %v767_v36, %v783_v50  ;;  %v785_v55 = vmul.f32 0.1, %v769_v45  ;;  %vm777_vm8 = vcmp.ge.f32.partialorder %v769_v45, 0.0 }
 0x35c   :  { %1443 = vmatmul.mubr.msk.f32.vlgmr.msra.gmra.mrb[4].mxu0 %vm677_vm2, %v789_v49  ;;  %v792_v58 = vsel %vm776_vm7, %v768_v46, %v784_v52  ;;  %v786_v59 = vmul.f32 0.1, %v770_v53  ;;  %vm778_vm9 = vcmp.ge.f32.partialorder %v770_v53, 0.0  ;;  %v787_v61 = vmul.f32 0.1, %v771_v56  ;;  %p1601_p12 = pnand %p1600_p11, %p1594_p8 }
 0x35d   :  { %1445 = vmatprep.mubr.msk.f32.mxu0 %vm677_vm2, %v790_v51  ;;  %v793_v60 = vsel %vm777_vm8, %v769_v45, %v785_v55  ;;  %vm779_vm10 = vcmp.ge.f32.partialorder %v771_v56, 0.0  ;;  %v928_v29 = vrot.slane %v1846_v28, %v1690_v16 }
 0x35e   :  { %v794_v62 = vsel %vm778_vm9, %v770_v53, %v786_v59  ;;  %v795_v63 = vsel %vm779_vm10, %v771_v56, %v787_v61 }
 0x360   :  { %1446 = vmatmul.mubr.msk.f32.gmra.mrb[6].mxu0 %vm677_vm2, %v791_v54 }
 0x361   :  { %1448 = vmatprep.mubr.msk.f32.mxu0 %vm677_vm2, %v792_v58 }
 0x364   :  { %1449 = vmatmul.mubr.msk.f32.gmra.mrb[8].mxu0 %vm677_vm2, %v793_v60  ;;  %v1191_v60 = vrot.slane %v1846_v28, %v1687_v15 }
 0x365   :  { %1451 = vmatprep.mubr.msk.f32.mxu0 %vm677_vm2, %v794_v62 }
 0x368   :  { %1452 = vmatmul.mubr.msk.f32.gmra.mrb[10].mxu0 %vm677_vm2, %v795_v63 }
 0x369   :  { %1498 = vmatprep.mubr.msk.f32.mxu0 %vm929_vm11, %v37_v1 }
 0x42f   :  { %v1444_v2 = vpop.f32.mrb[4].mxu0 }
 0x430   :  { %v886_v3 = vpop.f32.mrb[5].mxu0 }
 0x431   :  { %v1522_v4 = vpack.c.bf16 %v1444_v2, %v886_v3 }
 0x433   :  { %v1447_v5 = vpop.f32.mrb[6].mxu0  ;;  %1523 = vmatprep.subr.bf16.mxu1 %v1522_v4 }
 0x434   :  { %v896_v6 = vpop.f32.mrb[7].mxu0  ;;  %1525 = vmatpush3.bf16.msra.mxu1 %v1522_v4 }
 0x435   :  { %v1526_v7 = vpack.c.bf16 %v1447_v5, %v896_v6 }
 0x437   :  { %v1450_v8 = vpop.f32.mrb[8].mxu0  ;;  %1527 = vmatprep.subr.bf16.mxu1 %v1526_v7 }
 0x438   :  { %v906_v9 = vpop.f32.mrb[9].mxu0  ;;  %1529 = vmatpush3.bf16.msra.mxu1 %v1526_v7 }
 0x439   :  { %v1530_v10 = vpack.c.bf16 %v1450_v8, %v906_v9 }
 0x43b   :  { %v1453_v11 = vpop.f32.mrb[10].mxu0  ;;  %1531 = vmatprep.subr.bf16.mxu1 %v1530_v10 }
 0x43c   :  { %v916_v13 = vpop.f32.mrb[11].mxu0  ;;  %1533 = vmatpush3.bf16.msra.mxu1 %v1530_v10 }
 0x43d   :  { %v1534_v14 = vpack.c.bf16 %v1453_v11, %v916_v13 }
 0x43f   :  { %1535 = vmatprep.subr.bf16.mxu1 %v1534_v14 }
 0x440   :  { %1537 = vmatpush3.bf16.msra.mxu1 %v1534_v14 }
 0x443   :  { %1471 = vmatmul.mubr.msk.f32.vlgmr.msra.gmra.mrb[12].mxu1 %vm929_vm11, %v1803_v18 }
 0x444   :  { %1473 = vmatprep.mubr.msk.f32.mxu1 %vm929_vm11, %v1808_v19 }
 0x447   :  { %1474 = vmatmul.mubr.msk.f32.gmra.mrb[14].mxu1 %vm929_vm11, %v1817_v22 }
 0x448   :  { %1476 = vmatprep.mubr.msk.f32.mxu1 %vm929_vm11, %v1822_v23 }
 0x44b   :  { %1477 = vmatmul.mubr.msk.f32.gmra.mrb[16].mxu1 %vm929_vm11, %v1831_v24 }
 0x44c   :  { %1479 = vmatprep.mubr.msk.f32.mxu1 %vm929_vm11, %v1836_v25 }
 0x44f   :  { %1480 = vmatmul.mubr.msk.f32.gmra.mrb[18].mxu1 %vm929_vm11, %v44_v27 }
 0x516   :  { %v1472_v30 = vpop.f32.mrb[12].mxu1 }
 0x517   :  { %v1026_v31 = vadd.f32 %v1472_v30, %v928_v29  ;;  %v1020_v12 = vpop.f32.mrb[13].mxu1 }
 0x518   :  { %v1021_v32 = vadd.f32 %v1020_v12, %v928_v29 }
 0x519   :  { %vm1060_vm12 = vcmp.ge.f32.partialorder %v1026_v31, 0.0  ;;  %v1068_v37 = vmul.f32 0.1, %v1026_v31 }
 0x51a   :  { %vm1059_vm13 = vcmp.ge.f32.partialorder %v1021_v32, 0.0  ;;  %v1067_v38 = vmul.f32 0.1, %v1021_v32  ;;  %v1475_v39 = vpop.f32.mrb[14].mxu1 }
 0x51b   :  { %v1036_v17 = vadd.f32 %v1475_v39, %v928_v29  ;;  %v1030_v40 = vpop.f32.mrb[15].mxu1  ;;  %v1076_v33 = vsel %vm1060_vm12, %v1026_v31, %v1068_v37 }
 0x51c   :  { %v1031_v47 = vadd.f32 %v1030_v40, %v928_v29  ;;  %v1075_v57 = vsel %vm1059_vm13, %v1021_v32, %v1067_v38 }
 0x51d   :  { %vm1062_vm14 = vcmp.ge.f32.partialorder %v1036_v17, 0.0  ;;  %v1070_v35 = vmul.f32 0.1, %v1036_v17  ;;  %v1538_v20 = vpack.c.bf16 %v1076_v33, %v1075_v57 }
 0x51e   :  { %vm1061_vm15 = vcmp.ge.f32.partialorder %v1031_v47, 0.0  ;;  %v1069_v21 = vmul.f32 0.1, %v1031_v47  ;;  %v1478_v16 = vpop.f32.mrb[16].mxu1 }
 0x51f   :  { %v1046_v34 = vadd.f32 %v1478_v16, %v928_v29  ;;  %v1040_v36 = vpop.f32.mrb[17].mxu1  ;;  %1539 = vmatprep.subr.bf16.mxu0 %v1538_v20  ;;  %v1078_v46 = vsel %vm1062_vm14, %v1036_v17, %v1070_v35 }
 0x520   :  { %v1041_v0 = vadd.f32 %v1040_v36, %v928_v29  ;;  %1541 = vmatpush3.bf16.msra.mxu0 %v1538_v20  ;;  %v1077_v42 = vsel %vm1061_vm15, %v1031_v47, %v1069_v21 }
 0x521   :  { %vm1064_vm0 = vcmp.ge.f32.partialorder %v1046_v34, 0.0  ;;  %v1072_v43 = vmul.f32 0.1, %v1046_v34  ;;  %v1542_v44 = vpack.c.bf16 %v1078_v46, %v1077_v42 }
 0x522   :  { %vm1063_vm1 = vcmp.ge.f32.partialorder %v1041_v0, 0.0  ;;  %v1071_v48 = vmul.f32 0.1, %v1041_v0  ;;  %v1481_v49 = vpop.f32.mrb[18].mxu1 }
 0x523   :  { %v1056_v50 = vadd.f32 %v1481_v49, %v928_v29  ;;  %v1050_v45 = vpop.f32.mrb[19].mxu1  ;;  %1543 = vmatprep.subr.bf16.mxu0 %v1542_v44  ;;  %v1080_v41 = vsel %vm1064_vm0, %v1046_v34, %v1072_v43 }
 0x524   :  { %v1051_v51 = vadd.f32 %v1050_v45, %v928_v29  ;;  %1545 = vmatpush3.bf16.msra.mxu0 %v1542_v44  ;;  %v1079_v52 = vsel %vm1063_vm1, %v1041_v0, %v1071_v48  ;;  %v1227_v29 = vrot.slane %v1846_v28, %v1699_v26 }
 0x525   :  { %vm1066_vm3 = vcmp.ge.f32.partialorder %v1056_v50, 0.0  ;;  %v1074_v53 = vmul.f32 0.1, %v1056_v50  ;;  %v1546_v54 = vpack.c.bf16 %v1080_v41, %v1079_v52 }
 0x526   :  { %vm1065_vm4 = vcmp.ge.f32.partialorder %v1051_v51, 0.0  ;;  %v1073_v55 = vmul.f32 0.1, %v1051_v51 }
 0x527   :  { %1547 = vmatprep.subr.bf16.mxu0 %v1546_v54  ;;  %v1082_v56 = vsel %vm1066_vm3, %v1056_v50, %v1074_v53 }
 0x528   :  { %1549 = vmatpush3.bf16.msra.mxu0 %v1546_v54  ;;  %v1081_v58 = vsel %vm1065_vm4, %v1051_v51, %v1073_v55 }
 0x529   :  { %v1550_v59 = vpack.c.bf16 %v1082_v56, %v1081_v58 }
 0x52b   :  { %1551 = vmatprep.subr.bf16.mxu0 %v1550_v59 }
 0x52c   :  { %1553 = vmatpush3.bf16.msra.mxu0 %v1550_v59 }
 0x52f   :  { %1499 = vmatmul.mubr.msk.f32.vlgmr.msra.gmra.mrb[12].mxu0 %vm929_vm11, %v1803_v18 }
 0x530   :  { %1501 = vmatprep.mubr.msk.f32.mxu0 %vm929_vm11, %v1808_v19 }
 0x533   :  { %1502 = vmatmul.mubr.msk.f32.gmra.mrb[14].mxu0 %vm929_vm11, %v1817_v22 }
 0x534   :  { %1504 = vmatprep.mubr.msk.f32.mxu0 %vm929_vm11, %v1822_v23 }
 0x537   :  { %1505 = vmatmul.mubr.msk.f32.gmra.mrb[16].mxu0 %vm929_vm11, %v1831_v24 }
 0x538   :  { %1507 = vmatprep.mubr.msk.f32.mxu0 %vm929_vm11, %v1836_v25 }
 0x53b   :  { %1508 = vmatmul.mubr.msk.f32.gmra.mrb[18].mxu0 %vm929_vm11, %v44_v27 }
 0x602   :  { %v1500_v61 = vpop.f32.mrb[12].mxu0 }
 0x603   :  { %v1193_v62 = vmul.f32 %v1500_v61, %v1191_v60  ;;  %v1149_v63 = vpop.f32.mrb[13].mxu0 }
 0x604   :  { %v1192_v1 = vmul.f32 %v1191_v60, %v1149_v63 }
 0x605   :  { %v1203_v2 = vsel %vm677_vm2, %v1193_v62, 0.0 }
 0x606   :  { %1204 = vadd.xlane.f32.xlu1 %v1203_v2  ;;  %v1200_v3 = vsel %vm677_vm2, %v1192_v1, 0.0  ;;  %v1503_v4 = vpop.f32.mrb[14].mxu0 }
 0x607   :  { %1201 = vadd.xlane.f32.xlu0 %v1200_v3  ;;  %v1195_v5 = vmul.f32 %v1503_v4, %v1191_v60  ;;  %v1159_v6 = vpop.f32.mrb[15].mxu0 }
 0x608   :  { %v1194_v8 = vmul.f32 %v1191_v60, %v1159_v6 }
 0x609   :  { %v1209_v7 = vsel %vm677_vm2, %v1195_v5, 0.0 }
 0x60a   :  { %v1506_v9 = vpop.f32.mrb[16].mxu0  ;;  %v1206_v14 = vsel %vm677_vm2, %v1194_v8, 0.0 }
 0x60b   :  { %1210 = vadd.xlane.f32.xlu0 %v1209_v7  ;;  %v1169_v10 = vpop.f32.mrb[17].mxu0  ;;  %v1197_v15 = vmul.f32 %v1506_v9, %v1191_v60 }
 0x60c   :  { %v1196_v11 = vmul.f32 %v1191_v60, %v1169_v10 }
 0x60d   :  { %v1215_v24 = vsel %vm677_vm2, %v1197_v15, 0.0 }
 0x60e   :  { %v1509_v13 = vpop.f32.mrb[18].mxu0  ;;  %v1212_v18 = vsel %vm677_vm2, %v1196_v11, 0.0 }
 0x60f   :  { %1207 = vadd.xlane.f32.xlu0 %v1206_v14  ;;  %1213 = vadd.xlane.f32.xlu1 %v1212_v18  ;;  %v1179_v19 = vpop.f32.mrb[19].mxu0  ;;  %v1199_v22 = vmul.f32 %v1509_v13, %v1191_v60 }
 0x610   :  { %v1198_v23 = vmul.f32 %v1191_v60, %v1179_v19 }
 0x611   :  { %v1221_v27 = vsel %vm677_vm2, %v1199_v22, 0.0 }
 0x612   :  { %v1218_v25 = vsel %vm677_vm2, %v1198_v23, 0.0 }
 0x613   :  { %1216 = vadd.xlane.f32.xlu0 %v1215_v24  ;;  %1219 = vadd.xlane.f32.xlu1 %v1218_v25 }
 0x617   :  { %1222 = vadd.xlane.f32.xlu0 %v1221_v27 }
 0x693   :  { %v1205_v30 = vpop.xlane.xlu1 %1204 }
 0x694   :  { %v1229_v31 = vadd.f32 %v1227_v29, %v1205_v30  ;;  %v1202_v12 = vpop.xlane.xlu0 %1201 }
 0x695   :  { %v1228_v32 = vadd.f32 %v1227_v29, %v1202_v12 }
 0x696   :  { %1243 = vperm.xlu0 %1562, %v1229_v31  }
 0x697   :  { %1238 = vperm.xlu1 %1564, %v1228_v32  }
 0x698   :  { %v1211_v37 = vpop.xlane.xlu0 %1210 }
 0x699   :  { %v1231_v38 = vadd.f32 %v1227_v29, %v1211_v37 }
 0x69b   :  { %1253 = vperm.xlu1 %1564, %v1231_v38  }
 0x69c   :  { %v1208_v39 = vpop.xlane.xlu0 %1207  ;;  %v1214_v17 = vpop.xlane.xlu1 %1213 }
 0x69d   :  { %v1230_v40 = vadd.f32 %v1227_v29, %v1208_v39  ;;  %v1232_v33 = vadd.f32 %v1227_v29, %v1214_v17 }
 0x69f   :  { %1258 = vperm.xlu0 %1562, %v1232_v33   ;;  %1248 = vperm.xlu1 %1564, %v1230_v40  }
 0x6a0   :  { %v1217_v47 = vpop.xlane.xlu0 %1216  ;;  %v1220_v57 = vpop.xlane.xlu1 %1219 }
 0x6a1   :  { %v1233_v35 = vadd.f32 %v1227_v29, %v1217_v47  ;;  %v1234_v20 = vadd.f32 %v1227_v29, %v1220_v57 }
 0x6a3   :  { %1263 = vperm.xlu1 %1564, %v1233_v35   ;;  %1268 = vperm.xlu0 %1562, %v1234_v20  }
 0x6a4   :  { %v1223_v26 = vpop.xlane.xlu0 %1222 }
 0x6a5   :  { %v1235_v28 = vadd.f32 %v1227_v29, %v1223_v26 }
 0x6a7   :  { %1273 = vperm.xlu1 %1564, %v1235_v28  }
 0x715   :  { %v1244_v21 = vpop.permute.xlu0 %1243 }
 0x716   :  { %1277 = vst [vmem:[#allocation5 + $0x8] sm:$0xff] %v1244_v21  ;;  %v1239_v16 = vpop.permute.xlu1 %1238 }
 0x717   :  { %1276 = vst [vmem:[#allocation5] sm:$0xff] %v1239_v16 }
 0x71a   :  { %v1254_v34 = vpop.permute.xlu1 %1253 }
 0x71b   :  { %1279 = vst [vmem:[#allocation5 + $0x18] sm:$0xff] %v1254_v34 }
 0x71e   :  { %v1259_v36 = vpop.permute.xlu0 %1258  ;;  %v1249_v46 = vpop.permute.xlu1 %1248 }
 0x71f   :  { %1280 = vst [vmem:[#allocation5 + $0x20] sm:$0xff] %v1259_v36  ;;  %1278 = vst [vmem:[#allocation5 + $0x10] sm:$0xff] %v1249_v46 }
 0x722   :  { %v1269_v0 = vpop.permute.xlu0 %1268  ;;  %v1264_v42 = vpop.permute.xlu1 %1263 }
 0x723   :  { %1282 = vst [vmem:[#allocation5 + $0x30] sm:$0xff] %v1269_v0  ;;  %1281 = vst [vmem:[#allocation5 + $0x28] sm:$0xff] %v1264_v42 }
 0x726   :  { %v1274_v43 = vpop.permute.xlu1 %1273 }
 0x727   :  { %1283 = vst [vmem:[#allocation5 + $0x38] sm:$0xff] %v1274_v43 }
 0x728   :  { %1604 = shalt.err (!%p1601_p12)
}
 0x729   :  { %s1605_s7 = scalar_lea.hbm %s1893_s3, 1024 }
 0x72a   :  { %p1606_p13 = scmp.ne.s32.totalorder %s1893_s3, %s1605_s7  ;;  %p1609_p0 = scmp.lt.u32.totalorder %s1605_s7, %s1893_s3 }
 0x72c   :  { %p1611_p1 = pnand %p1609_p0, %p1606_p13 }
 0x72e   :  { %1614 = shalt.err (!%p1611_p1)
}
 0x72f   :  { %1295 = dma.vmem_to_hbm [thread:$0]  %s1290_s2, 1024, %s1893_s3, [#allocation4], %s1620_s22, %s1620_s22, %s1621_s23  }
 0x730   :  { %1617 = dma.done.wait [#allocation4], 1024  }
 0x731   :  { %1618 = vsyncadd [#allocation4], 4294966272 }
 0x732   :  { %1299 = vsyncpa [#allocation3], 1 }
 0x733   :  { %1300 = vsyncpa [#allocation4], 1 }

</bundles_post_ra>
